<compile_context>
chip_gen: v6e
topology: v6e:2x2x1
jax: 0.10.0
libtpu: 0.0.40
codegen_flags: <defaults>
</compile_context>

<pallas_src>
import functools

import jax
import jax.numpy as jnp
from jax.experimental import pallas as pl
from jax.experimental.pallas import tpu as pltpu


def _gem_kernel(x_ref, o_ref, acc_ref, *, p, inv_p, eps, inv_count):
    # x_ref:   (TR, TS)  rows = flattened (n, c) pairs, lanes = spatial positions
    # o_ref:   (TR, 1)
    # acc_ref: (TR, TS)  f32 accumulator, persists across the spatial grid axis
    s = pl.program_id(1)

    @pl.when(s == 0)
    def _():
        acc_ref[...] = jnp.zeros_like(acc_ref)

    x = x_ref[...].astype(jnp.float32)
    # x.clamp(min=eps).pow(p); elementwise accumulate (pure VPU work per step).
    acc_ref[...] += jnp.maximum(x, eps) ** p

    @pl.when(s == pl.num_programs(1) - 1)
    def _():
        total = jnp.sum(acc_ref[...], axis=1, keepdims=True)   # (TR, 1) cross-lane
        mean = total * inv_count                                # .mean(dim=(2, 3))
        o_ref[...] = (mean ** inv_p).astype(o_ref.dtype)        # .pow(1/p)


def _largest_aligned_divisor(total, quantum, limit):
    """Largest multiple of `quantum` that divides `total` and is <= limit, or None."""
    t = (min(limit, total) // quantum) * quantum
    while t >= quantum:
        if total % t == 0:
            return t
        t -= quantum
    return None


def gem_pool(x, p=3, eps: float = 1e-6):
    """Generalized Mean pooling. x: (N, C, H, W) -> (N, C)."""
    N, C, H, W = x.shape
    R = N * C          # rows (sublane axis)
    S = H * W          # spatial (lane axis, reduced)

    # Keep p an int when integral so the forward pow stays on the cheap VPU path.
    if float(p).is_integer():
        p = int(p)

    # Zero-copy view: contiguous NCHW -> (N*C, H*W). No relayout pass over HBM.
    x2 = x.reshape(R, S)

    itemsize = jnp.dtype(x.dtype).itemsize
    # Sublane packing: f32 -> 8, bf16 -> 16, int8/fp8 -> 32.
    sub = 8 * max(1, 4 // itemsize)

    # ---- Tile selection ----------------------------------------------------
    BLOCK_BUDGET = 8 * 1024 * 1024  # per input buffer (double-buffered by Pallas)

    # Spatial tile: full S when it fits (commonest GeM case); otherwise the
    # largest multiple-of-128 divisor of S under the budget.  Full extent is
    # always layout-legal even when S % 128 != 0.
    max_ts = max(128, BLOCK_BUDGET // (sub * itemsize))
    if S <= max_ts:
        TS = S
    else:
        TS = _largest_aligned_divisor(S, 128, max_ts)
        if TS is None:
            TS = S  # no aligned divisor: take the full extent (correct, bigger block)

    # Row tile: largest sublane-aligned divisor of R under the budget; prefer
    # keeping >= 2 row blocks so the "parallel" axis feeds v7x's 2nd TensorCore.
    max_tr = max(sub, BLOCK_BUDGET // max(1, TS * itemsize))
    TR = None
    if R >= 2 * sub:
        TR = _largest_aligned_divisor(R, sub, min(max_tr, R // 2))
    if TR is None:
        TR = _largest_aligned_divisor(R, sub, max_tr)
    if TR is None and sub > 8:
        TR = _largest_aligned_divisor(R, 8, max_tr)
    if TR is None:
        TR = R  # full extent is always legal

    grid = (pl.cdiv(R, TR), pl.cdiv(S, TS))

    kernel = functools.partial(
        _gem_kernel, p=p, inv_p=1.0 / p, eps=eps, inv_count=1.0 / S
    )

    cost = pl.CostEstimate(
        flops=3 * R * S,                 # clamp + integer-pow + accumulate
        transcendentals=R,               # one pow(1/p) per output element
        bytes_accessed=R * S * itemsize + R * itemsize,
    )

    out = pl.pallas_call(
        kernel,
        out_shape=jax.ShapeDtypeStruct((R, 1), x.dtype),
        grid=grid,
        in_specs=[
            pl.BlockSpec((TR, TS), lambda r, s: (r, s)),
        ],
        out_specs=pl.BlockSpec((TR, 1), lambda r, s: (r, 0)),
        scratch_shapes=[pltpu.VMEM((TR, TS), jnp.float32)],
        compiler_params=pltpu.CompilerParams(
            # Row blocks are independent (megacore-shardable); the spatial axis
            # is the reduction (output block constant along it).
            dimension_semantics=("parallel", "arbitrary"),
            # 2 x 8 MiB input buffers + f32 accumulator << 48 MiB; safe on
            # v7x's 64 MiB VMEM, roomy on v5e/v6e's 128 MiB.
            vmem_limit_bytes=48 * 1024 * 1024,
        ),
        cost_estimate=cost,
    )(x2)

    return out.reshape(N, C)


if __name__ == "__main__":
    # GeM has no runtime inputs besides x (p=3, eps=1e-6 are fixed scalars here).
    key = jax.random.PRNGKey(0)
    x = jax.random.normal(key, (2, 4, 16, 16), dtype=jnp.float32)

    out = gem_pool(x, p=3, eps=1e-6)
    out = jax.block_until_ready(out)

    # Reference check in plain JAX (same semantics as the PyTorch forward).
    ref = jnp.mean(jnp.maximum(x, 1e-6) ** 3, axis=(2, 3)) ** (1.0 / 3)
    assert out.shape == (2, 4)
    assert jnp.allclose(out, ref, rtol=1e-5, atol=1e-6)

    print("KERNEL_OK")
</pallas_src>

<mosaic_0001>
module attributes {stable_mosaic.version = 11 : i64} {
  func.func @_gem_kernel(%arg0: i32, %arg1: i32, %arg2: memref<8x256xf32, #tpu.memory_space<vmem>>, %arg3: memref<8x1xf32, #tpu.memory_space<vmem>>, %arg4: memref<8x256xf32, #tpu.memory_space<vmem>>) attributes {dimension_semantics = [#tpu.dimension_semantics<parallel>, #tpu.dimension_semantics<arbitrary>], iteration_bounds = array<i64: 1, 1>, scalar_prefetch = 0 : i64, scratch_operands = 1 : i64, tpu.core_type = #tpu.core_type<tc>, window_params = [{transform_indices = @transform_0, window_bounds = array<i64: 8, 256>}, {transform_indices = @transform_1, window_bounds = array<i64: 8, 1>}]} {
    %c0_i32 = arith.constant 0 : i32
    %0 = arith.cmpi eq, %arg1, %c0_i32 : i32
    %1 = arith.extui %0 : i1 to i32
    %c0_i32_0 = arith.constant 0 : i32
    %2 = arith.cmpi ne, %1, %c0_i32_0 : i32
    scf.if %2 {
      %cst_8 = arith.constant 0.000000e+00 : f32
      %14 = vector.broadcast %cst_8 : f32 to vector<8x256xf32>
      %c0_9 = arith.constant 0 : index
      %c0_10 = arith.constant 0 : index
      %15 = vector.load %arg4[%c0_9, %c0_10] : memref<8x256xf32, #tpu.memory_space<vmem>>, vector<8x256xf32>
      tpu.vector_store %arg4[%c0_9, %c0_10], %14 {strides = array<i32>} : memref<8x256xf32, #tpu.memory_space<vmem>>, vector<8x256xf32>,
    } else {
    }
    %c0 = arith.constant 0 : index
    %c0_1 = arith.constant 0 : index
    %3 = vector.load %arg2[%c0, %c0_1] : memref<8x256xf32, #tpu.memory_space<vmem>>, vector<8x256xf32>
    %c0_2 = arith.constant 0 : index
    %c0_3 = arith.constant 0 : index
    %4 = vector.load %arg4[%c0_2, %c0_3] : memref<8x256xf32, #tpu.memory_space<vmem>>, vector<8x256xf32>
    %cst = arith.constant 9.99999997E-7 : f32
    %5 = vector.broadcast %cst : f32 to vector<8x256xf32>
    %6 = arith.maximumf %3, %5 : vector<8x256xf32>
    %7 = arith.mulf %6, %6 : vector<8x256xf32>
    %8 = arith.mulf %6, %7 : vector<8x256xf32>
    %9 = arith.addf %4, %8 : vector<8x256xf32>
    %c0_4 = arith.constant 0 : index
    %c0_5 = arith.constant 0 : index
    %10 = vector.load %arg4[%c0_4, %c0_5] : memref<8x256xf32, #tpu.memory_space<vmem>>, vector<8x256xf32>
    tpu.vector_store %arg4[%c0_4, %c0_5], %9 {strides = array<i32>} : memref<8x256xf32, #tpu.memory_space<vmem>>, vector<8x256xf32>,
    %c0_i32_6 = arith.constant 0 : i32
    %11 = arith.cmpi eq, %arg1, %c0_i32_6 : i32
    %12 = arith.extui %11 : i1 to i32
    %c0_i32_7 = arith.constant 0 : i32
    %13 = arith.cmpi ne, %12, %c0_i32_7 : i32
    scf.if %13 {
      %c0_8 = arith.constant 0 : index
      %c0_9 = arith.constant 0 : index
      %14 = vector.load %arg4[%c0_8, %c0_9] : memref<8x256xf32, #tpu.memory_space<vmem>>, vector<8x256xf32>
      %cst_10 = arith.constant dense<0.000000e+00> : vector<8xf32>
      %15 = vector.multi_reduction <add>, %14, %cst_10 [1] : vector<8x256xf32> to vector<8xf32>
      %16 = vector.shape_cast %15 : vector<8xf32> to vector<8x1xf32>
      %cst_11 = arith.constant 3.906250e-03 : f32
      %17 = vector.broadcast %cst_11 : f32 to vector<8x1xf32>
      %18 = arith.mulf %16, %17 : vector<8x1xf32>
      %cst_12 = arith.constant 0.333333343 : f32
      %19 = vector.broadcast %cst_12 : f32 to vector<8x1xf32>
      %20 = math.powf %18, %19 : vector<8x1xf32>
      %c0_13 = arith.constant 0 : index
      %c0_14 = arith.constant 0 : index
      %21 = vector.load %arg3[%c0_13, %c0_14] : memref<8x1xf32, #tpu.memory_space<vmem>>, vector<8x1xf32>
      tpu.vector_store %arg3[%c0_13, %c0_14], %20 {strides = array<i32>} : memref<8x1xf32, #tpu.memory_space<vmem>>, vector<8x1xf32>,
    } else {
    }
    return
  }
  func.func @transform_0(%arg0: i32, %arg1: i32) -> (i32, i32) {
    %c0_i32 = arith.constant 0 : i32
    return %arg0, %arg1 : i32, i32
  }
  func.func @transform_1(%arg0: i32, %arg1: i32) -> (i32, i32) {
    %c0_i32 = arith.constant 0 : i32
    %c0_i32_0 = arith.constant 0 : i32
    return %arg0, %c0_i32 : i32, i32
  }
}

</mosaic_0001>

<bundles_post_ra>
// kernel: tpu_custom_call.1
= control target key start
LH: loop header
LB: loop body
LE: loop exit
PB: predicated region body
PF: predicated region fallthrough
CT: control target
= control target key end

     0   :  { %6 = vsyncpa [#allocation4], 0  ;;  %s102_s6 = smov [#allocation3]   ;;  %s119_s0 = inlined_call_operand.hbm [shape: f32[8,256], index: 0, kind: input, shape index: {}]   ;;  %s120_s1 = inlined_call_operand.vmem [shape: f32[8,1], index: 1, kind: output, shape index: {}]  }
   0x1   :  { %s13_s7 = sshll.u32 %s102_s6, 4  ;;  %s14_s7 = int_to_ptr.vmem [resolvable:$true] %s13_s7 }
   0x2   :  { %s88_s8 = scalar_lea.vmem %s14_s7, 256  ;;  %p93_p1 = scmp.lt.s32.totalorder %s14_s7, %s14_s7 }
   0x3   :  { %p89_p0 = scmp.ne.s32.totalorder %s14_s7, %s88_s8  ;;  %p94_p2 = scmp.lt.s32.totalorder %s88_s8, %s88_s8 }
   0x5   :  { %p95_p3 = por %p94_p2, %p93_p1 }
   0x7   :  { %p96_p4 = pnand %p95_p3, %p89_p0 }
   0x9   :  { %99 = shalt.err (!%p96_p4)
}
   0xa   :  { %16 = dma.hbm_to_vmem [thread:$0]  %s119_s0, 256, %s14_s7, [#allocation4]  }
   0xb   :  { %100 = dma.done.wait [#allocation4], 256  }
   0xc   :  { %101 = vsyncadd [#allocation4], 4294967040  ;;  %v26_v0 = vld [vmem:[#allocation3] sm:$0xff]  ;;  %v27_v1 = vld [vmem:[#allocation3 + $0x8] sm:$0xff]  ;;  %vm50_vm4 = vcmask 7168  }
   0xd   :  { %v30_v2 = vmax.f32 %v26_v0, 1e-06  ;;  %v31_v3 = vmax.f32 %v27_v1, 1e-06 }
   0xf   :  { %v32_v4 = vmul.f32 %v30_v2, %v30_v2  ;;  %v33_v5 = vmul.f32 %v31_v3, %v31_v3 }
  0x11   :  { %v34_v6 = vmul.f32 %v32_v4, %v30_v2  ;;  %v35_v7 = vmul.f32 %v33_v5, %v31_v3 }
  0x13   :  { %v45_v8 = vadd.f32 %v35_v7, %v34_v6 }
  0x15   :  { %46 = vadd.xlane.f32.xlu0 %v45_v8 }
  0x9e   :  { %v47_v9 = vpop.xlane.xlu0 %46 }
  0x9f   :  { %v48_v10 = vmul.f32 0.00390625, %v47_v9 }
  0xa1   :  { %v59_v11 = vand.u32 2147483647, %v48_v10  ;;  %v63_v14 = vand.u32 2147483648, %v48_v10  ;;  %vm58_vm2 = vcmp.lt.f32.partialorder %v48_v10, 0.0  ;;  %vm57_vm3 = vcmp.eq.f32.partialorder %v48_v10, 0.0 }
  0xa3   :  { %76 = vlog2.f32 %v59_v11  ;;  %vm67_vm0 = vweird.f32 %v59_v11  ;;  %vm69_vm1 = vcmp.eq.f32.partialorder %v59_v11, 0.0  ;;  %vm60_vm5 = vcmp.eq.f32.partialorder %v59_v11, inf }
  0xb0   :  { %v77_v12 = vpop.eup %76 }
  0xb1   :  { %v64_v13 = vmul.f32 0.33333334, %v77_v12 }
  0xb3   :  { %78 = vpow2.f32 %v64_v13 }
  0xc0   :  { %v79_v15 = vpop.eup %78 }
  0xc1   :  { %v66_v16 = vor.u32 %v79_v15, %v63_v14 }
  0xc3   :  { %v68_v17 = vsel %vm67_vm0, %v48_v10, %v66_v16 }
  0xc4   :  { %v71_v18 = vsel %vm69_vm1, %v63_v14, %v68_v17 }
  0xc5   :  { %v72_v19 = vsel %vm58_vm2, nan, %v71_v18 }
  0xc6   :  { %v73_v20 = vsel %vm57_vm3, 0.0, %v72_v19 }
  0xc7   :  { %v74_v21 = vsel %vm60_vm5, inf, %v73_v20 }
  0xc8   :  { %51 = vst.msk [vmem:[%s120_s1] sm:$0xff] %vm50_vm4, %v74_v21 }
  0xc9   :  { %56 = vsyncpa [#allocation4], 1 }

</bundles_post_ra>
